<compile_context>
chip_gen: v6e
topology: v6e:2x2x1
jax: 0.10.0
libtpu: 0.0.40
codegen_flags: <defaults>
</compile_context>

<pallas_src>
import jax
import jax.numpy as jnp
from jax.experimental import pallas as pl
from jax.experimental.pallas import tpu as pltpu


# ---------------------------------------------------------------------------
# Fused Pallas kernel (whole forward pass, one batch tile per grid step)
# ---------------------------------------------------------------------------
def _make_fused_kernel(num_dtnn, num_fc_rep, n_nodes):
    N = n_nodes

    def kernel(*refs):
        it = iter(refs)
        x_ref = next(it)                                   # (BB, N, F)
        d_ref = next(it)                                   # (BB, N, N, R)
        dtnn_w = [[next(it) for _ in range(5)] for _ in range(num_dtnn)]
        fc_rep_w = [[next(it) for _ in range(2)] for _ in range(num_fc_rep)]
        w_out = next(it)                                   # (F_last, O)
        b_out = next(it)                                   # (1, O)
        o_ref = next(it)                                   # (BB, 1, O)

        x = x_ref[...].astype(jnp.float32)                 # (BB, N, F)
        d = d_ref[...].astype(jnp.float32)                 # (BB, N, N, R)
        BB = x.shape[0]
        Fdim = x.shape[-1]
        R = d.shape[-1]

        # Hoisted, layer-independent neighbor reduction:
        #   sum_j Wdf(d[i, j]) = (sum_j d[i, j]) @ Wdf + N * bdf
        d_sum = jnp.sum(d, axis=2).reshape(BB * N, R)      # (BB*N, R)
        h = x.reshape(BB * N, Fdim)                        # (BB*N, F) rows -> MXU M dim

        for wcf, bcf, wdf, bdf, wfc in dtnn_w:
            a = jnp.dot(h, wcf[...], preferred_element_type=jnp.float32) + bcf[...]
            g = (jnp.dot(d_sum, wdf[...], preferred_element_type=jnp.float32)
                 + jnp.float32(N) * bdf[...])
            o = jnp.dot(a * g, wfc[...], preferred_element_type=jnp.float32)
            h = o + jnp.tanh(o)                            # fused residual from represent()

        # Fused epilogue: node sum (torch.sum dim=1) + fc_represent_layers + fc_layers
        y = jnp.sum(h.reshape(BB, N, Fdim), axis=1)        # (BB, F)
        for w, b in fc_rep_w:
            y = jnp.dot(y, w[...], preferred_element_type=jnp.float32) + b[...]
        y = jnp.dot(y, w_out[...], preferred_element_type=jnp.float32) + b_out[...]

        o_ref[...] = y[:, None, :].astype(o_ref.dtype)

    return kernel


# ---------------------------------------------------------------------------
# Wrapper
# ---------------------------------------------------------------------------
def dtnn_forward(params, x, distance, batch_tile=None):
    B, N, Fdim = x.shape
    R = distance.shape[-1]
    out_dim = params["fc_out"][0].shape[1]
    num_dtnn = len(params["dtnn"])
    num_fc_rep = len(params["fc_rep"])

    if batch_tile is None:
        # Keep the parallel grid extent >= 2 (v7x has 2 TensorCores) while packing
        # as many batch rows as possible into each matmul's M dimension.
        batch_tile = B // 2 if (B >= 2 and B % 2 == 0) else 1
    if batch_tile < 1 or B % batch_tile != 0:
        batch_tile = 1
    grid = (B // batch_tile,)

    full2d = lambda gi: (0, 0)   # weights / biases are fully resident

    args = [x, distance]
    in_specs = [
        pl.BlockSpec((batch_tile, N, Fdim), lambda gi: (gi, 0, 0)),
        pl.BlockSpec((batch_tile, N, N, R), lambda gi: (gi, 0, 0, 0)),
    ]
    for lyr in params["dtnn"]:
        for name in ("wcf", "bcf", "wdf", "bdf", "wfc"):
            arr = lyr[name]
            args.append(arr)
            in_specs.append(pl.BlockSpec(arr.shape, full2d))
    for w, b in params["fc_rep"]:
        args += [w, b]
        in_specs += [pl.BlockSpec(w.shape, full2d), pl.BlockSpec(b.shape, full2d)]
    w_out, b_out = params["fc_out"]
    args += [w_out, b_out]
    in_specs += [pl.BlockSpec(w_out.shape, full2d), pl.BlockSpec(b_out.shape, full2d)]

    kernel = _make_fused_kernel(num_dtnn, num_fc_rep, N)

    out = pl.pallas_call(
        kernel,
        out_shape=jax.ShapeDtypeStruct((B, 1, out_dim), jnp.float32),
        grid=grid,
        in_specs=in_specs,
        out_specs=pl.BlockSpec((batch_tile, 1, out_dim), lambda gi: (gi, 0, 0)),
        compiler_params=pltpu.CompilerParams(dimension_semantics=("parallel",)),
    )(*args)
    return out.reshape(B, out_dim)


# ---------------------------------------------------------------------------
# Parameter init (deterministic, PyTorch-Linear-like uniform bounds)
# ---------------------------------------------------------------------------
def init_linear(key, in_dim, out_dim, bias=True):
    kw, kb = jax.random.split(key)
    bound = 1.0 / float(in_dim) ** 0.5
    w = jax.random.uniform(kw, (in_dim, out_dim), jnp.float32, -bound, bound)
    if bias:
        b = jax.random.uniform(kb, (1, out_dim), jnp.float32, -bound, bound)
        return w, b
    return w, None


def init_params(key, node_feature_dim, rbf_dim, hidden_dims, fc_hidden_dims, output_dim):
    params = {"dtnn": [], "fc_rep": []}
    for h in hidden_dims:
        key, k1, k2, k3 = jax.random.split(key, 4)
        wcf, bcf = init_linear(k1, node_feature_dim, h)
        wdf, bdf = init_linear(k2, rbf_dim, h)
        wfc, _ = init_linear(k3, h, node_feature_dim, bias=False)
        params["dtnn"].append(dict(wcf=wcf, bcf=bcf, wdf=wdf, bdf=bdf, wfc=wfc))
    fc_dims = [node_feature_dim] + list(fc_hidden_dims)
    for i, o in zip(fc_dims[:-1], fc_dims[1:]):
        key, k = jax.random.split(key)
        params["fc_rep"].append(init_linear(k, i, o))
    key, k = jax.random.split(key)
    params["fc_out"] = init_linear(k, fc_dims[-1], output_dim)
    return params


# ---------------------------------------------------------------------------
# Pure-JAX reference (kept in the original N^2 formulation to validate the
# algebraic neighbor-sum hoist used inside the kernel)
# ---------------------------------------------------------------------------
def ref_forward(params, x, distance):
    for lyr in params["dtnn"]:
        a = x @ lyr["wcf"] + lyr["bcf"]                      # (B,N,H)
        d = distance @ lyr["wdf"] + lyr["bdf"]               # (B,N,N,H)
        o = (a[:, :, None, :] * d) @ lyr["wfc"]              # (B,N,N,F)
        o = o.sum(axis=2)
        x = o + jnp.tanh(o)
    x = x.sum(axis=1)
    for w, b in params["fc_rep"]:
        x = x @ w + b
    w, b = params["fc_out"]
    return x @ w + b


# ---------------------------------------------------------------------------
if __name__ == "__main__":
    # Small config consistent with the module's __init__ signature.
    B, N = 2, 8
    node_feature_dim = 16
    rbf_dim = 8
    hidden_dims = [32, 32]        # `hidden_dim` list -> gin_layers_dim
    fc_hidden_dims = [32, 16]
    output_dim = 4

    root = jax.random.PRNGKey(0)
    kp, kx, kd = jax.random.split(root, 3)
    params = init_params(kp, node_feature_dim, rbf_dim, hidden_dims, fc_hidden_dims, output_dim)
    x = jax.random.normal(kx, (B, N, node_feature_dim), jnp.float32)
    distance = jax.random.normal(kd, (B, N, N, rbf_dim), jnp.float32)

    out = dtnn_forward(params, x, distance)
    out = jax.block_until_ready(out)

    ref = jax.block_until_ready(ref_forward(params, x, distance))
    assert out.shape == (B, output_dim)
    assert jnp.allclose(out, ref, rtol=1e-4, atol=1e-4), (out, ref)

    print("KERNEL_OK")
</pallas_src>

<mosaic_0001>
module attributes {stable_mosaic.version = 11 : i64} {
  func.func @kernel(%arg0: i32, %arg1: memref<1x8x16xf32, #tpu.memory_space<vmem>>, %arg2: memref<1x8x8x8xf32, #tpu.memory_space<vmem>>, %arg3: memref<16x32xf32, #tpu.memory_space<vmem>>, %arg4: memref<1x32xf32, #tpu.memory_space<vmem>>, %arg5: memref<8x32xf32, #tpu.memory_space<vmem>>, %arg6: memref<1x32xf32, #tpu.memory_space<vmem>>, %arg7: memref<32x16xf32, #tpu.memory_space<vmem>>, %arg8: memref<16x32xf32, #tpu.memory_space<vmem>>, %arg9: memref<1x32xf32, #tpu.memory_space<vmem>>, %arg10: memref<8x32xf32, #tpu.memory_space<vmem>>, %arg11: memref<1x32xf32, #tpu.memory_space<vmem>>, %arg12: memref<32x16xf32, #tpu.memory_space<vmem>>, %arg13: memref<16x32xf32, #tpu.memory_space<vmem>>, %arg14: memref<1x32xf32, #tpu.memory_space<vmem>>, %arg15: memref<32x16xf32, #tpu.memory_space<vmem>>, %arg16: memref<1x16xf32, #tpu.memory_space<vmem>>, %arg17: memref<16x4xf32, #tpu.memory_space<vmem>>, %arg18: memref<1x4xf32, #tpu.memory_space<vmem>>, %arg19: memref<1x1x4xf32, #tpu.memory_space<vmem>>) attributes {dimension_semantics = [#tpu.dimension_semantics<parallel>], iteration_bounds = array<i64: 2>, scalar_prefetch = 0 : i64, scratch_operands = 0 : i64, tpu.core_type = #tpu.core_type<tc>, window_params = [{transform_indices = @transform_0, window_bounds = array<i64: 1, 8, 16>}, {transform_indices = @transform_1, window_bounds = array<i64: 1, 8, 8, 8>}, {pipeline_mode = #tpu.pipeline_mode<synchronous>, transform_indices = @transform_2, window_bounds = array<i64: 16, 32>}, {pipeline_mode = #tpu.pipeline_mode<synchronous>, transform_indices = @transform_3, window_bounds = array<i64: 1, 32>}, {pipeline_mode = #tpu.pipeline_mode<synchronous>, transform_indices = @transform_4, window_bounds = array<i64: 8, 32>}, {pipeline_mode = #tpu.pipeline_mode<synchronous>, transform_indices = @transform_5, window_bounds = array<i64: 1, 32>}, {pipeline_mode = #tpu.pipeline_mode<synchronous>, transform_indices = @transform_6, window_bounds = array<i64: 32, 16>}, {pipeline_mode = #tpu.pipeline_mode<synchronous>, transform_indices = @transform_7, window_bounds = array<i64: 16, 32>}, {pipeline_mode = #tpu.pipeline_mode<synchronous>, transform_indices = @transform_8, window_bounds = array<i64: 1, 32>}, {pipeline_mode = #tpu.pipeline_mode<synchronous>, transform_indices = @transform_9, window_bounds = array<i64: 8, 32>}, {pipeline_mode = #tpu.pipeline_mode<synchronous>, transform_indices = @transform_10, window_bounds = array<i64: 1, 32>}, {pipeline_mode = #tpu.pipeline_mode<synchronous>, transform_indices = @transform_11, window_bounds = array<i64: 32, 16>}, {pipeline_mode = #tpu.pipeline_mode<synchronous>, transform_indices = @transform_12, window_bounds = array<i64: 16, 32>}, {pipeline_mode = #tpu.pipeline_mode<synchronous>, transform_indices = @transform_13, window_bounds = array<i64: 1, 32>}, {pipeline_mode = #tpu.pipeline_mode<synchronous>, transform_indices = @transform_14, window_bounds = array<i64: 32, 16>}, {pipeline_mode = #tpu.pipeline_mode<synchronous>, transform_indices = @transform_15, window_bounds = array<i64: 1, 16>}, {pipeline_mode = #tpu.pipeline_mode<synchronous>, transform_indices = @transform_16, window_bounds = array<i64: 16, 4>}, {pipeline_mode = #tpu.pipeline_mode<synchronous>, transform_indices = @transform_17, window_bounds = array<i64: 1, 4>}, {transform_indices = @transform_18, window_bounds = array<i64: 1, 1, 4>}]} {
    %c0 = arith.constant 0 : index
    %c0_0 = arith.constant 0 : index
    %c0_1 = arith.constant 0 : index
    %0 = vector.load %arg1[%c0, %c0_0, %c0_1] : memref<1x8x16xf32, #tpu.memory_space<vmem>>, vector<1x8x16xf32>
    %c0_2 = arith.constant 0 : index
    %c0_3 = arith.constant 0 : index
    %c0_4 = arith.constant 0 : index
    %c0_5 = arith.constant 0 : index
    %1 = vector.load %arg2[%c0_2, %c0_3, %c0_4, %c0_5] : memref<1x8x8x8xf32, #tpu.memory_space<vmem>>, vector<1x8x8x8xf32>
    %cst = arith.constant dense<0.000000e+00> : vector<1x8x8xf32>
    %2 = vector.multi_reduction <add>, %1, %cst [2] : vector<1x8x8x8xf32> to vector<1x8x8xf32>
    %3 = vector.shape_cast %2 : vector<1x8x8xf32> to vector<8x8xf32>
    %4 = vector.shape_cast %0 : vector<1x8x16xf32> to vector<8x16xf32>
    %c0_6 = arith.constant 0 : index
    %c0_7 = arith.constant 0 : index
    %5 = vector.load %arg3[%c0_6, %c0_7] : memref<16x32xf32, #tpu.memory_space<vmem>>, vector<16x32xf32>
    %cst_8 = arith.constant dense<0.000000e+00> : vector<8x32xf32>
    %6 = tpu.matmul %4, %5, %cst_8 {dimension_numbers = #tpu.dot_dimension_numbers<[1], [0], [0], [1], [0, 0, 1, 1], [], []>} : vector<8x16xf32>, vector<16x32xf32>, vector<8x32xf32> -> vector<8x32xf32>
    %c0_9 = arith.constant 0 : index
    %c0_10 = arith.constant 0 : index
    %7 = vector.load %arg4[%c0_9, %c0_10] : memref<1x32xf32, #tpu.memory_space<vmem>>, vector<1x32xf32>
    %8 = vector.broadcast %7 : vector<1x32xf32> to vector<8x32xf32>
    %9 = arith.addf %6, %8 : vector<8x32xf32>
    %c0_11 = arith.constant 0 : index
    %c0_12 = arith.constant 0 : index
    %10 = vector.load %arg5[%c0_11, %c0_12] : memref<8x32xf32, #tpu.memory_space<vmem>>, vector<8x32xf32>
    %cst_13 = arith.constant dense<0.000000e+00> : vector<8x32xf32>
    %11 = tpu.matmul %3, %10, %cst_13 {dimension_numbers = #tpu.dot_dimension_numbers<[1], [0], [0], [1], [0, 0, 1, 1], [], []>} : vector<8x8xf32>, vector<8x32xf32>, vector<8x32xf32> -> vector<8x32xf32>
    %c0_14 = arith.constant 0 : index
    %c0_15 = arith.constant 0 : index
    %12 = vector.load %arg6[%c0_14, %c0_15] : memref<1x32xf32, #tpu.memory_space<vmem>>, vector<1x32xf32>
    %cst_16 = arith.constant 8.000000e+00 : f32
    %13 = vector.broadcast %cst_16 : f32 to vector<1x32xf32>
    %14 = arith.mulf %13, %12 : vector<1x32xf32>
    %15 = vector.broadcast %14 : vector<1x32xf32> to vector<8x32xf32>
    %16 = arith.addf %11, %15 : vector<8x32xf32>
    %17 = arith.mulf %9, %16 : vector<8x32xf32>
    %c0_17 = arith.constant 0 : index
    %c0_18 = arith.constant 0 : index
    %18 = vector.load %arg7[%c0_17, %c0_18] : memref<32x16xf32, #tpu.memory_space<vmem>>, vector<32x16xf32>
    %cst_19 = arith.constant dense<0.000000e+00> : vector<8x16xf32>
    %19 = tpu.matmul %17, %18, %cst_19 {dimension_numbers = #tpu.dot_dimension_numbers<[1], [0], [0], [1], [0, 0, 1, 1], [], []>} : vector<8x32xf32>, vector<32x16xf32>, vector<8x16xf32> -> vector<8x16xf32>
    %20 = math.tanh %19 : vector<8x16xf32>
    %21 = arith.addf %19, %20 : vector<8x16xf32>
    %c0_20 = arith.constant 0 : index
    %c0_21 = arith.constant 0 : index
    %22 = vector.load %arg8[%c0_20, %c0_21] : memref<16x32xf32, #tpu.memory_space<vmem>>, vector<16x32xf32>
    %cst_22 = arith.constant dense<0.000000e+00> : vector<8x32xf32>
    %23 = tpu.matmul %21, %22, %cst_22 {dimension_numbers = #tpu.dot_dimension_numbers<[1], [0], [0], [1], [0, 0, 1, 1], [], []>} : vector<8x16xf32>, vector<16x32xf32>, vector<8x32xf32> -> vector<8x32xf32>
    %c0_23 = arith.constant 0 : index
    %c0_24 = arith.constant 0 : index
    %24 = vector.load %arg9[%c0_23, %c0_24] : memref<1x32xf32, #tpu.memory_space<vmem>>, vector<1x32xf32>
    %25 = vector.broadcast %24 : vector<1x32xf32> to vector<8x32xf32>
    %26 = arith.addf %23, %25 : vector<8x32xf32>
    %c0_25 = arith.constant 0 : index
    %c0_26 = arith.constant 0 : index
    %27 = vector.load %arg10[%c0_25, %c0_26] : memref<8x32xf32, #tpu.memory_space<vmem>>, vector<8x32xf32>
    %cst_27 = arith.constant dense<0.000000e+00> : vector<8x32xf32>
    %28 = tpu.matmul %3, %27, %cst_27 {dimension_numbers = #tpu.dot_dimension_numbers<[1], [0], [0], [1], [0, 0, 1, 1], [], []>} : vector<8x8xf32>, vector<8x32xf32>, vector<8x32xf32> -> vector<8x32xf32>
    %c0_28 = arith.constant 0 : index
    %c0_29 = arith.constant 0 : index
    %29 = vector.load %arg11[%c0_28, %c0_29] : memref<1x32xf32, #tpu.memory_space<vmem>>, vector<1x32xf32>
    %cst_30 = arith.constant 8.000000e+00 : f32
    %30 = vector.broadcast %cst_30 : f32 to vector<1x32xf32>
    %31 = arith.mulf %30, %29 : vector<1x32xf32>
    %32 = vector.broadcast %31 : vector<1x32xf32> to vector<8x32xf32>
    %33 = arith.addf %28, %32 : vector<8x32xf32>
    %34 = arith.mulf %26, %33 : vector<8x32xf32>
    %c0_31 = arith.constant 0 : index
    %c0_32 = arith.constant 0 : index
    %35 = vector.load %arg12[%c0_31, %c0_32] : memref<32x16xf32, #tpu.memory_space<vmem>>, vector<32x16xf32>
    %cst_33 = arith.constant dense<0.000000e+00> : vector<8x16xf32>
    %36 = tpu.matmul %34, %35, %cst_33 {dimension_numbers = #tpu.dot_dimension_numbers<[1], [0], [0], [1], [0, 0, 1, 1], [], []>} : vector<8x32xf32>, vector<32x16xf32>, vector<8x16xf32> -> vector<8x16xf32>
    %37 = math.tanh %36 : vector<8x16xf32>
    %38 = arith.addf %36, %37 : vector<8x16xf32>
    %39 = vector.shape_cast %38 : vector<8x16xf32> to vector<1x8x16xf32>
    %cst_34 = arith.constant dense<0.000000e+00> : vector<1x16xf32>
    %40 = vector.multi_reduction <add>, %39, %cst_34 [1] : vector<1x8x16xf32> to vector<1x16xf32>
    %c0_35 = arith.constant 0 : index
    %c0_36 = arith.constant 0 : index
    %41 = vector.load %arg13[%c0_35, %c0_36] : memref<16x32xf32, #tpu.memory_space<vmem>>, vector<16x32xf32>
    %cst_37 = arith.constant dense<0.000000e+00> : vector<1x32xf32>
    %42 = tpu.matmul %40, %41, %cst_37 {dimension_numbers = #tpu.dot_dimension_numbers<[1], [0], [0], [1], [0, 0, 1, 1], [], []>} : vector<1x16xf32>, vector<16x32xf32>, vector<1x32xf32> -> vector<1x32xf32>
    %c0_38 = arith.constant 0 : index
    %c0_39 = arith.constant 0 : index
    %43 = vector.load %arg14[%c0_38, %c0_39] : memref<1x32xf32, #tpu.memory_space<vmem>>, vector<1x32xf32>
    %44 = arith.addf %42, %43 : vector<1x32xf32>
    %c0_40 = arith.constant 0 : index
    %c0_41 = arith.constant 0 : index
    %45 = vector.load %arg15[%c0_40, %c0_41] : memref<32x16xf32, #tpu.memory_space<vmem>>, vector<32x16xf32>
    %cst_42 = arith.constant dense<0.000000e+00> : vector<1x16xf32>
    %46 = tpu.matmul %44, %45, %cst_42 {dimension_numbers = #tpu.dot_dimension_numbers<[1], [0], [0], [1], [0, 0, 1, 1], [], []>} : vector<1x32xf32>, vector<32x16xf32>, vector<1x16xf32> -> vector<1x16xf32>
    %c0_43 = arith.constant 0 : index
    %c0_44 = arith.constant 0 : index
    %47 = vector.load %arg16[%c0_43, %c0_44] : memref<1x16xf32, #tpu.memory_space<vmem>>, vector<1x16xf32>
    %48 = arith.addf %46, %47 : vector<1x16xf32>
    %c0_45 = arith.constant 0 : index
    %c0_46 = arith.constant 0 : index
    %49 = vector.load %arg17[%c0_45, %c0_46] : memref<16x4xf32, #tpu.memory_space<vmem>>, vector<16x4xf32>
    %cst_47 = arith.constant dense<0.000000e+00> : vector<1x4xf32>
    %50 = tpu.matmul %48, %49, %cst_47 {dimension_numbers = #tpu.dot_dimension_numbers<[1], [0], [0], [1], [0, 0, 1, 1], [], []>} : vector<1x16xf32>, vector<16x4xf32>, vector<1x4xf32> -> vector<1x4xf32>
    %c0_48 = arith.constant 0 : index
    %c0_49 = arith.constant 0 : index
    %51 = vector.load %arg18[%c0_48, %c0_49] : memref<1x4xf32, #tpu.memory_space<vmem>>, vector<1x4xf32>
    %52 = arith.addf %50, %51 : vector<1x4xf32>
    %53 = vector.shape_cast %52 : vector<1x4xf32> to vector<1x1x4xf32>
    %c0_50 = arith.constant 0 : index
    %c0_51 = arith.constant 0 : index
    %c0_52 = arith.constant 0 : index
    %54 = vector.load %arg19[%c0_50, %c0_51, %c0_52] : memref<1x1x4xf32, #tpu.memory_space<vmem>>, vector<1x1x4xf32>
    tpu.vector_store %arg19[%c0_50, %c0_51, %c0_52], %53 {strides = array<i32>} : memref<1x1x4xf32, #tpu.memory_space<vmem>>, vector<1x1x4xf32>,
    return
  }
  func.func @transform_0(%arg0: i32) -> (i32, i32, i32) {
    %c0_i32 = arith.constant 0 : i32
    %c0_i32_0 = arith.constant 0 : i32
    %c0_i32_1 = arith.constant 0 : i32
    return %arg0, %c0_i32, %c0_i32_0 : i32, i32, i32
  }
  func.func @transform_1(%arg0: i32) -> (i32, i32, i32, i32) {
    %c0_i32 = arith.constant 0 : i32
    %c0_i32_0 = arith.constant 0 : i32
    %c0_i32_1 = arith.constant 0 : i32
    %c0_i32_2 = arith.constant 0 : i32
    return %arg0, %c0_i32, %c0_i32_0, %c0_i32_1 : i32, i32, i32, i32
  }
  func.func @transform_2(%arg0: i32) -> (i32, i32) {
    %c0_i32 = arith.constant 0 : i32
    %c0_i32_0 = arith.constant 0 : i32
    %c0_i32_1 = arith.constant 0 : i32
    return %c0_i32, %c0_i32_0 : i32, i32
  }
  func.func @transform_3(%arg0: i32) -> (i32, i32) {
    %c0_i32 = arith.constant 0 : i32
    %c0_i32_0 = arith.constant 0 : i32
    %c0_i32_1 = arith.constant 0 : i32
    return %c0_i32, %c0_i32_0 : i32, i32
  }
  func.func @transform_4(%arg0: i32) -> (i32, i32) {
    %c0_i32 = arith.constant 0 : i32
    %c0_i32_0 = arith.constant 0 : i32
    %c0_i32_1 = arith.constant 0 : i32
    return %c0_i32, %c0_i32_0 : i32, i32
  }
  func.func @transform_5(%arg0: i32) -> (i32, i32) {
    %c0_i32 = arith.constant 0 : i32
    %c0_i32_0 = arith.constant 0 : i32
    %c0_i32_1 = arith.constant 0 : i32
    return %c0_i32, %c0_i32_0 : i32, i32
  }
  func.func @transform_6(%arg0: i32) -> (i32, i32) {
    %c0_i32 = arith.constant 0 : i32
    %c0_i32_0 = arith.constant 0 : i32
    %c0_i32_1 = arith.constant 0 : i32
    return %c0_i32, %c0_i32_0 : i32, i32
  }
  func.func @transform_7(%arg0: i32) -> (i32, i32) {
    %c0_i32 = arith.constant 0 : i32
    %c0_i32_0 = arith.constant 0 : i32
    %c0_i32_1 = arith.constant 0 : i32
    return %c0_i32, %c0_i32_0 : i32, i32
  }
  func.func @transform_8(%arg0: i32) -> (i32, i32) {
    %c0_i32 = arith.constant 0 : i32
    %c0_i32_0 = arith.constant 0 : i32
    %c0_i32_1 = arith.constant 0 : i32
    return %c0_i32, %c0_i32_0 : i32, i32
  }
  func.func @transform_9(%arg0: i32) -> (i32, i32) {
    %c0_i32 = arith.constant 0 : i32
    %c0_i32_0 = arith.constant 0 : i32
    %c0_i32_1 = arith.constant 0 : i32
    return %c0_i32, %c0_i32_0 : i32, i32
  }
  func.func @transform_10(%arg0: i32) -> (i32, i32) {
    %c0_i32 = arith.constant 0 : i32
    %c0_i32_0 = arith.constant 0 : i32
    %c0_i32_1 = arith.constant 0 : i32
    return %c0_i32, %c0_i32_0 : i32, i32
  }
  func.func @transform_11(%arg0: i32) -> (i32, i32) {
    %c0_i32 = arith.constant 0 : i32
    %c0_i32_0 = arith.constant 0 : i32
    %c0_i32_1 = arith.constant 0 : i32
    return %c0_i32, %c0_i32_0 : i32, i32
  }
  func.func @transform_12(%arg0: i32) -> (i32, i32) {
    %c0_i32 = arith.constant 0 : i32
    %c0_i32_0 = arith.constant 0 : i32
    %c0_i32_1 = arith.constant 0 : i32
    return %c0_i32, %c0_i32_0 : i32, i32
  }
  func.func @transform_13(%arg0: i32) -> (i32, i32) {
    %c0_i32 = arith.constant 0 : i32
    %c0_i32_0 = arith.constant 0 : i32
    %c0_i32_1 = arith.constant 0 : i32
    return %c0_i32, %c0_i32_0 : i32, i32
  }
  func.func @transform_14(%arg0: i32) -> (i32, i32) {
    %c0_i32 = arith.constant 0 : i32
    %c0_i32_0 = arith.constant 0 : i32
    %c0_i32_1 = arith.constant 0 : i32
    return %c0_i32, %c0_i32_0 : i32, i32
  }
  func.func @transform_15(%arg0: i32) -> (i32, i32) {
    %c0_i32 = arith.constant 0 : i32
    %c0_i32_0 = arith.constant 0 : i32
    %c0_i32_1 = arith.constant 0 : i32
    return %c0_i32, %c0_i32_0 : i32, i32
  }
  func.func @transform_16(%arg0: i32) -> (i32, i32) {
    %c0_i32 = arith.constant 0 : i32
    %c0_i32_0 = arith.constant 0 : i32
    %c0_i32_1 = arith.constant 0 : i32
    return %c0_i32, %c0_i32_0 : i32, i32
  }
  func.func @transform_17(%arg0: i32) -> (i32, i32) {
    %c0_i32 = arith.constant 0 : i32
    %c0_i32_0 = arith.constant 0 : i32
    %c0_i32_1 = arith.constant 0 : i32
    return %c0_i32, %c0_i32_0 : i32, i32
  }
  func.func @transform_18(%arg0: i32) -> (i32, i32, i32) {
    %c0_i32 = arith.constant 0 : i32
    %c0_i32_0 = arith.constant 0 : i32
    %c0_i32_1 = arith.constant 0 : i32
    return %arg0, %c0_i32, %c0_i32_0 : i32, i32, i32
  }
}

</mosaic_0001>

<bundles_post_ra>
// kernel: tpu_custom_call.1
= control target key start
LH: loop header
LB: loop body
LE: loop exit
PB: predicated region body
PF: predicated region fallthrough
CT: control target
= control target key end

     0   :  { %s2769_s0 = inlined_call_operand.hbm [shape: f32[2,8,16], index: 0, kind: input, shape index: {}]   ;;  %s2770_s1 = inlined_call_operand.vmem [shape: f32[2,8,8,8], index: 1, kind: input, shape index: {}]   ;;  %s2771_s2 = inlined_call_operand.hbm [shape: f32[16,32], index: 2, kind: input, shape index: {}]   ;;  %s2772_s3 = inlined_call_operand.hbm [shape: f32[1,32], index: 3, kind: input, shape index: {}]   ;;  %s2773_s4 = inlined_call_operand.hbm [shape: f32[8,32], index: 4, kind: input, shape index: {}]   ;;  %s2774_s5 = inlined_call_operand.hbm [shape: f32[1,32], index: 5, kind: input, shape index: {}]   ;;  %s2775_s6 = inlined_call_operand.vmem [shape: f32[32,16], index: 6, kind: input, shape index: {}]   ;;  %s2776_s7 = inlined_call_operand.hbm [shape: f32[16,32], index: 7, kind: input, shape index: {}]   ;;  %s2777_s8 = inlined_call_operand.hbm [shape: f32[1,32], index: 8, kind: input, shape index: {}]   ;;  %s2778_s9 = inlined_call_operand.hbm [shape: f32[8,32], index: 9, kind: input, shape index: {}]   ;;  %s2779_s10 = inlined_call_operand.vmem [shape: f32[1,32], index: 10, kind: input, shape index: {}]   ;;  %s2780_s11 = inlined_call_operand.vmem [shape: f32[32,16], index: 11, kind: input, shape index: {}]   ;;  %s2781_s12 = inlined_call_operand.hbm [shape: f32[16,32], index: 12, kind: input, shape index: {}]   ;;  %s2782_s13 = inlined_call_operand.vmem [shape: f32[1,32], index: 13, kind: input, shape index: {}]   ;;  %s2783_s14 = inlined_call_operand.vmem [shape: f32[32,16], index: 14, kind: input, shape index: {}]   ;;  %s2784_s15 = inlined_call_operand.vmem [shape: f32[1,16], index: 15, kind: input, shape index: {}]   ;;  %s2785_s16 = inlined_call_operand.vmem [shape: f32[16,4], index: 16, kind: input, shape index: {}]   ;;  %s2786_s17 = inlined_call_operand.vmem [shape: f32[1,4], index: 17, kind: input, shape index: {}]   ;;  %s2787_s18 = inlined_call_operand.hbm [shape: f32[2,1,4], index: 18, kind: output, shape index: {}]  }
   0x1   :  { %2795 = sst [smem:[#allocation24_spill]] %s2769_s0 }
   0x2   :  { %2796 = sst [smem:[#allocation25_spill]] %s2770_s1 }
   0x3   :  { %2797 = sst [smem:[#allocation26_spill]] %s2771_s2 }
   0x4   :  { %2798 = sst [smem:[#allocation27_spill]] %s2772_s3 }
   0x5   :  { %2799 = sst [smem:[#allocation28_spill]] %s2773_s4 }
   0x6   :  { %2800 = sst [smem:[#allocation29_spill]] %s2774_s5 }
   0x7   :  { %2801 = sst [smem:[#allocation30_spill]] %s2776_s7 }
   0x8   :  { %2802 = sst [smem:[#allocation31_spill]] %s2777_s8 }
   0x9   :  { %2803 = sst [smem:[#allocation32_spill]] %s2778_s9 }
   0xa   :  { %2804 = sst [smem:[#allocation33_spill]] %s2781_s12 }
   0xb   :  { %2805 = sst [smem:[#allocation34_spill]] %s2782_s13 }
   0xc   :  { %2806 = sst [smem:[#allocation35_spill]] %s2784_s15 }
   0xd   :  { %2807 = sst [smem:[#allocation36_spill]] %s2786_s17 }
   0xe   :  { %2808 = sst [smem:[#allocation37_spill]] %s2787_s18 }
   0xf   :  { %23 = vsyncpa [#allocation3], 0 }
  0x10   :  { %25 = vsyncpa [#allocation3 + $0x1], 0 }
  0x11   :  { %26 = vsyncpa [#allocation6], 0 }
  0x12   :  { %27 = vsyncpa [#allocation9], 0 }
  0x13   :  { %28 = vsyncpa [#allocation12], 0 }
  0x14   :  { %29 = vsyncpa [#allocation15], 0 }
  0x15   :  { %30 = vsyncpa [#allocation4], 0 }
  0x16   :  { %32 = vsyncpa [#allocation4 + $0x1], 0  ;;  %s2400_s27 = smov 0   ;;  %s2402_s28 = smov 0  }
  0x17   :  { %s2404_s29 = smov 0   ;;  %s2406_s30 = smov 0  }
  0x18 LB: > { %s2291_s0 = smov [#allocation5]   ;;  %s2421_s1 = sadd.s32 4294967295, %s2289_s30   ;;  %s2289_s30 = sphi %s2406_s30, %s2849_s30   ;;  %s2285_s29 = sphi %s2404_s29, %s2848_s29   ;;  %s2281_s28 = sphi %s2402_s28, %s2847_s28   ;;  %s2277_s27 = sphi %s2400_s27, %s2846_s27  }
  0x19   : > { %s469_s19 = sshll.u32 %s2291_s0, 4  ;;  %p1697_p0 = scmp.ge.s32.totalorder %s2289_s30, 1  ;;  %s470_s19 = int_to_ptr.vmem [resolvable:$true] %s469_s19 }
  0x1a   : > { %p2790_p1 = scmp.eq.s32.totalorder %s2421_s1, 0  ;;  %p457_p2 = scmp.lt.s32.totalorder %s2289_s30, 3 }
  0x1b   : > { %s2292_s21 = smov [#allocation8]   ;;  %s2293_s23 = smov [#allocation11]  }
  0x1c   : > { %p2426_p3 = pnand %p1697_p0, %p457_p2  ;;  %s494_s22 = sshll.u32 %s2292_s21, 4  ;;  %s495_s22 = int_to_ptr.vmem [resolvable:$true] %s494_s22 }
  0x1d   : > { %s518_s24 = sshll.u32 %s2293_s23, 4  ;;  %s1984_s26 = scalar_lea.vmem %s470_s19, 256  ;;  %s2439_s24 = int_to_ptr.vmem [resolvable:$true] %s518_s24 }
  0x1e   : > { %s2809_s20 = scalar_select %p2426_p3, 1, 0 }
  0x1f   : > { %p1874_p5 = pneg %p2426_p3  ;;  %p1985_p8 = scmp.ne.s32.totalorder %s470_s19, %s1984_s26 }
  0x20   : > { %p1992_p11 = scmp.lt.s32.totalorder %s470_s19, %s470_s19  ;;  %p1993_p12 = scmp.lt.s32.totalorder %s1984_s26, %s1984_s26 }
  0x21   : > { %p2435_p6 = pnand %p1874_p5, %p2790_p1 }
  0x22   : > { %p1994_p13 = por %p1993_p12, %p1992_p11 }
  0x23   : > { %p2443_p7 = pneg %p2435_p6 }
  0x25   : > { %p1987_p9 = pnand %p1985_p8, %p2443_p7 }
  0x27   : > { %p1988_p10 = pneg %p1987_p9 }
  0x29   : > { %p1995_p0 = pnand %p1994_p13, %p1988_p10 }
  0x2b   : > { %1998 = shalt.err (!%p1995_p0)
}
  0x2c   : > { %s2791_s0 = smov 128   ;;  %s2295_s21 = smov 8  }
  0x2d   : > { %s2812_s17 = sld [smem:[#allocation26_spill]]  ;;  %s2010_s15 = scalar_lea.vmem %s495_s22, 128 }
  0x2e   : > { %p2011_p2 = scmp.ne.s32.totalorder %s495_s22, %s2010_s15  ;;  %p2018_p9 = scmp.lt.s32.totalorder %s495_s22, %s495_s22 }
  0x2f   : > { %p2019_p10 = scmp.lt.s32.totalorder %s2010_s15, %s2010_s15 }
  0x30   : > { %p2013_p5 = pnand %p2011_p2, %p2443_p7 }
  0x31   : > { %p2020_p11 = por %p2019_p10, %p2018_p9 }
  0x32   : > { %p2014_p8 = pneg %p2013_p5 }
  0x33   : > { %1877 = dma.hbm_to_vmem [thread:$0]  (!%p2435_p6), %s2812_s17, 256, %s470_s19, [#allocation6], %s2791_s0, %s2791_s0, %s2295_s21  }
  0x34   : > { %p2021_p12 = pnand %p2020_p11, %p2014_p8 }
  0x36   : > { %2024 = shalt.err (!%p2021_p12)
}
  0x37   : > { %s2813_s4 = sld [smem:[#allocation28_spill]]  ;;  %s2036_s17 = scalar_lea.vmem %s2439_s24, 256 }
  0x38   : > { %p2037_p13 = scmp.ne.s32.totalorder %s2439_s24, %s2036_s17  ;;  %p2044_p5 = scmp.lt.s32.totalorder %s2439_s24, %s2439_s24 }
  0x39   : > { %p2045_p9 = scmp.lt.s32.totalorder %s2036_s17, %s2036_s17 }
  0x3a   : > { %p2039_p0 = pnand %p2037_p13, %p2443_p7 }
  0x3b   : > { %p2046_p8 = por %p2045_p9, %p2044_p5 }
  0x3c   : > { %p2040_p2 = pneg %p2039_p0 }
  0x3d   : > { %1883 = dma.hbm_to_vmem [thread:$0]  (!%p2435_p6), %s2813_s4, 128, %s495_s22, [#allocation9]  }
  0x3e   : > { %p2047_p10 = pnand %p2046_p8, %p2040_p2 }
  0x40   : > { %2050 = shalt.err (!%p2047_p10)
}
  0x41   : > { %s2814_s7 = sld [smem:[#allocation30_spill]]  ;;  %s2296_s18 = smov [#allocation14]  }
  0x42   : > { %s543_s19 = sshll.u32 %s2296_s18, 4  ;;  %s2297_s22 = smov [#allocation7]   ;;  %s544_s19 = int_to_ptr.vmem [resolvable:$true] %s543_s19 }
  0x43   : > { %s483_s23 = sshll.u32 %s2297_s22, 4  ;;  %s2062_s26 = scalar_lea.vmem %s544_s19, 128  ;;  %s484_s23 = int_to_ptr.vmem [resolvable:$true] %s483_s23 }
  0x44   : > { %p2063_p11 = scmp.ne.s32.totalorder %s544_s19, %s2062_s26  ;;  %p2070_p0 = scmp.lt.s32.totalorder %s544_s19, %s544_s19 }
  0x45   : > { %p2071_p2 = scmp.lt.s32.totalorder %s2062_s26, %s2062_s26 }
  0x46   : > { %p2065_p12 = pnand %p2063_p11, %p2443_p7 }
  0x47   : > { %1889 = dma.hbm_to_vmem [thread:$0]  (!%p2435_p6), %s2814_s7, 256, %s2439_s24, [#allocation12], %s2791_s0, %s2791_s0, %s2295_s21  }
  0x48   : > { %p2066_p13 = pneg %p2065_p12  ;;  %p2072_p5 = por %p2071_p2, %p2070_p0 }
  0x4a   : > { %p2073_p9 = pnand %p2072_p5, %p2066_p13 }
  0x4c   : > { %2076 = shalt.err (!%p2073_p9)
}
  0x4d   : > { %s2815_s9 = sld [smem:[#allocation32_spill]]  ;;  %s2088_s24 = scalar_lea.vmem %s484_s23, 16 }
  0x4e   : > { %p2089_p8 = scmp.ne.s32.totalorder %s484_s23, %s2088_s24  ;;  %s2095_s15 = scalar_lea.vmem %s484_s23, 32 }
  0x4f   : > { %p2096_p11 = scmp.lt.s32.totalorder %s484_s23, %s484_s23  ;;  %p2097_p12 = scmp.lt.s32.totalorder %s2095_s15, %s2088_s24 }
  0x50   : > { %p2091_p10 = pnand %p2089_p8, %p2443_p7 }
  0x51   : > { %p2098_p1 = por %p2097_p12, %p2096_p11 }
  0x52   : > { %p2092_p4 = pneg %p2091_p10 }
  0x53   : > { %1895 = dma.hbm_to_vmem [thread:$0]  (!%p2435_p6), %s2815_s9, 128, %s544_s19, [#allocation15]  }
  0x54   : > { %p2099_p0 = pnand %p2098_p1, %p2092_p4 }
  0x56   : > { %2102 = shalt.err (!%p2099_p0)
}
  0x57   : > { %s2816_s3 = sld [smem:[#allocation27_spill]]  ;;  %s2298_s19 = smov [#allocation10]  }
  0x58   : > { %s505_s26 = sshll.u32 %s2298_s19, 4  ;;  %s2299_s17 = smov [#allocation13]   ;;  %s506_s26 = int_to_ptr.vmem [resolvable:$true] %s505_s26 }
  0x59   : > { %s532_s13 = sshll.u32 %s2299_s17, 4  ;;  %s2114_s0 = scalar_lea.vmem %s506_s26, 16  ;;  %s533_s13 = int_to_ptr.vmem [resolvable:$true] %s532_s13 }
  0x5a   : > { %p2115_p13 = scmp.ne.s32.totalorder %s506_s26, %s2114_s0  ;;  %s2121_s24 = scalar_lea.vmem %s506_s26, 32 }
  0x5b   : > { %p2122_p1 = scmp.lt.s32.totalorder %s506_s26, %s506_s26  ;;  %p2123_p4 = scmp.lt.s32.totalorder %s2121_s24, %s2114_s0 }
  0x5c   : > { %p2117_p2 = pnand %p2115_p13, %p2443_p7 }
  0x5d   : > { %1880 = dma.hbm_to_vmem [thread:$0]  (!%p2435_p6), %s2816_s3, 16, %s484_s23, [#allocation6]  }
  0x5e   : > { %p2118_p5 = pneg %p2117_p2  ;;  %p2124_p9 = por %p2123_p4, %p2122_p1 }
  0x60   : > { %p2125_p8 = pnand %p2124_p9, %p2118_p5 }
  0x62   : > { %2128 = shalt.err (!%p2125_p8)
}
  0x63   : > { %s2817_s5 = sld [smem:[#allocation29_spill]]  ;;  %s2140_s18 = scalar_lea.vmem %s533_s13, 16 }
  0x64   : > { %p2141_p10 = scmp.ne.s32.totalorder %s533_s13, %s2140_s18  ;;  %s2147_s22 = scalar_lea.vmem %s533_s13, 32 }
  0x65   : > { %p2148_p0 = scmp.lt.s32.totalorder %s533_s13, %s533_s13  ;;  %p2149_p13 = scmp.lt.s32.totalorder %s2147_s22, %s2140_s18 }
  0x66   : > { %p2143_p11 = pnand %p2141_p10, %p2443_p7 }
  0x67   : > { %p2150_p2 = por %p2149_p13, %p2148_p0 }
  0x68   : > { %p2144_p12 = pneg %p2143_p11 }
  0x69   : > { %1886 = dma.hbm_to_vmem [thread:$0]  (!%p2435_p6), %s2817_s5, 16, %s506_s26, [#allocation9]  }
  0x6a   : > { %p2151_p1 = pnand %p2150_p2, %p2144_p12 }
  0x6c   : > { %2154 = shalt.err (!%p2151_p1)
}
  0x6d   : > { %s2818_s8 = sld [smem:[#allocation31_spill]]  ;;  %s2300_s26 = smov [#allocation16]  }
  0x6e   : > { %s559_s17 = sshll.u32 %s2300_s26, 4  ;;  %s560_s17 = int_to_ptr.vmem [resolvable:$true] %s559_s17 }
  0x6f   : > { %s2166_s24 = scalar_lea.vmem %s560_s17, 256  ;;  %p2174_p8 = scmp.lt.s32.totalorder %s560_s17, %s560_s17 }
  0x70   : > { %p2167_p5 = scmp.ne.s32.totalorder %s560_s17, %s2166_s24  ;;  %p2175_p10 = scmp.lt.s32.totalorder %s2166_s24, %s2166_s24 }
  0x72   : > { %p2169_p4 = pnand %p2167_p5, %p2443_p7  ;;  %p2176_p11 = por %p2175_p10, %p2174_p8 }
  0x73   : > { %1892 = dma.hbm_to_vmem [thread:$0]  (!%p2435_p6), %s2818_s8, 16, %s533_s13, [#allocation12]  }
  0x74   : > { %p2170_p9 = pneg %p2169_p4 }
  0x76   : > { %p2177_p12 = pnand %p2176_p11, %p2170_p9 }
  0x78   : > { %2180 = shalt.err (!%p2177_p12)
}
  0x79   : > { %s2819_s15 = smov 128   ;;  %s2820_s12 = sld [smem:[#allocation33_spill]] }
  0x7a   : > { %s1696_s2 = sadd.s32 4294967294, %s2289_s30   ;;  %s2519_s25 = sadd.s32 1, %s2289_s30  }
  0x7b   : > { %s42_s18 = ssub.s32 %s2289_s30, %s2519_s25  ;;  %s45_s22 = sadd.s32 1, %s2285_s29 }
  0x7c   : > { %p43_p7 = scmp.eq.s32.totalorder %s42_s18, 0  ;;  %p52_p0 = scmp.ne.s32.totalorder %s2285_s29, %s2281_s28 }
  0x7d   : > { %p53_p13 = scmp.eq.s32.totalorder %s2289_s30, 0  ;;  %p58_p2 = scmp.ne.s32.totalorder %s2281_s28, %s2277_s27 }
  0x7e   : > { %s2530_s0 = scalar_select %p43_p7, %s2285_s29, %s45_s22  }
  0x7f   : > { %1898 = dma.hbm_to_vmem [thread:$0]  (!%p2435_p6), %s2820_s12, 256, %s560_s17, [#allocation15], %s2819_s15, %s2819_s15, %s2295_s21  }
  0x80   : > { %p2532_p1 = por %p53_p13, %p52_p0  ;;  %p2822_p5 = scmp.eq.s32.totalorder %s2421_s1, 0 }
  0x81   : > { %p444_p4 = scmp.eq.s32.totalorder %s2421_s1, 1  ;;  %p450_p9 = scmp.eq.s32.totalorder %s1696_s2, 1 }
  0x82   : > { %p2538_p6 = por %p2822_p5, %p58_p2  ;;  %p1915_p8 = scmp.lt.s32.totalorder %s2289_s30, 2 }
  0x83   : > { %s588_s26 = sand.u32 1, %s2285_s29   ;;  %p2545_p10 = por %p444_p4, %p52_p0 }
  0x84   : > { %s2823_s21 = scalar_select %p2538_p6, 1, 0 }
  0x85   : > { %s2824_s17 = scalar_select %p2545_p10, 1, 0 }
  0x86   : > { %p2549_p11 = por %p450_p9, %p58_p2  ;;  %s1707_s15 = sshll.u32 %s588_s26, 3 }
  0x87   : > { %s1708_s23 = sshll.u32 %s2289_s30, 7  ;;  %s2826_s22 = sld [smem:[#allocation24_spill]] }
  0x88   : > { %s2825_s24 = scalar_select %p2549_p11, 1, 0 }
  0x89   : > { %s592_s2 = scalar_lea.vmem [#allocation2], %s1707_s15  ;;  %p2561_p12 = pnand %p1915_p8, %p2532_p1 }
  0x8a   : > { %s599_s4 = sshll.u32 %s592_s2, 4  ;;  %s589_s7 = scalar_lea.sflag [#allocation3], %s588_s26  ;;  %s600_s4 = int_to_ptr.vmem [resolvable:$true] %s599_s4 }
  0x8b   : > { %p2183_p0 = pneg %p2561_p12 }
  0x8d   : > { %s2557_s3 = scalar_lea.hbm %s2826_s22, %s1708_s23  ;;  %s2186_s18 = scalar_lea.hbm %s2826_s22, 256 }
  0x8e   : > { %s2181_s8 = scalar_lea.hbm %s2557_s3, 128  ;;  %p2187_p5 = scmp.lt.s32.totalorder %s2557_s3, %s2826_s22 }
  0x8f   : > { %p2182_p7 = scmp.ne.s32.totalorder %s2557_s3, %s2181_s8  ;;  %p2188_p1 = scmp.lt.s32.totalorder %s2186_s18, %s2181_s8 }
  0x91   : > { %p2184_p13 = pnand %p2183_p0, %p2182_p7  ;;  %p2189_p4 = por %p2188_p1, %p2187_p5 }
  0x93   : > { %p2185_p2 = pneg %p2184_p13 }
  0x95   : > { %p2190_p9 = pnand %p2189_p4, %p2185_p2 }
  0x97   : > { %2193 = shalt.err (!%p2190_p9)
}
  0x98   : > { %s2194_s19 = scalar_lea.vmem %s600_s4, 128  ;;  %s2301_s26 = smov [#allocation2]  }
  0x99   : > { %p2195_p8 = scmp.ne.s32.totalorder %s600_s4, %s2194_s19  ;;  %s2199_s9 = sshll.u32 %s2301_s26, 4  ;;  %s2200_s9 = int_to_ptr.vmem [resolvable:$false] %s2199_s9 }
  0x9a   : > { %s2201_s12 = scalar_lea.vmem %s2200_s9, 256  ;;  %p2202_p7 = scmp.lt.s32.totalorder %s600_s4, %s2200_s9 }
  0x9b   : > { %p2197_p11 = pnand %p2195_p8, %p2183_p0  ;;  %p2203_p13 = scmp.lt.s32.totalorder %s2201_s12, %s2194_s19 }
  0x9d   : > { %p2198_p10 = pneg %p2197_p11  ;;  %p2204_p6 = por %p2203_p13, %p2202_p7 }
  0x9f   : > { %p2205_p3 = pnand %p2204_p6, %p2198_p10 }
  0xa1   : > { %2208 = shalt.err (!%p2205_p3)
}
  0xa2   : > { %1902 = dma.hbm_to_vmem [thread:$0]  (!%p2561_p12), %s2557_s3, 128, %s600_s4, %s589_s7  }
  0xa3   : > { %p2828_p2 = scmp.ne.s32.totalorder %s2809_s20, 0 }
  0xa4   : > { %s2582_s8 = sand.u32 (!%p2828_p2), 1, %s2281_s28   ;;  %p2829_p11 = scmp.ne.s32.totalorder (!%p2828_p2), %s2823_s21, 0 }
  0xa5   : > { %616 = sbr.rel (%p2828_p2) target bundleno = 1638 (0x666), region = 92  ;;  %s1710_s23 = sshll.u32 (!%p2828_p2), %s2582_s8, 3 }
  0xa6   : > { %s619_s13 = scalar_lea.sflag (!%p2828_p2), [#allocation3], %s2582_s8  ;;  %s622_s9 = scalar_lea.vmem (!%p2828_p2), [#allocation2], %s1710_s23 }
  0xaa   : > { %2252 = dma.done.wait (%p2829_p11), %s619_s13, 128  }
  0xab   : > { %2254 = vsyncadd (%p2829_p11), %s619_s13, 4294967168  ;;  %p2830_p3 = scmp.eq.s32.totalorder %s2421_s1, 0 }
  0xad   : > { %2256 = dma.done.wait (%p2830_p3), [#allocation6], 272   ;;  %p2831_p6 = pmov %p2830_p3 }
  0xae   : > { %p2832_p10 = pmov %p2830_p3 }
  0xaf   : > { %2258 = vsyncadd (%p2831_p6), [#allocation6], 4294967024 }
  0xb0   : > { %2260 = dma.done.wait (%p2832_p10), [#allocation9], 144   ;;  %p2833_p12 = pmov %p2830_p3 }
  0xb1   : > { %p2834_p0 = pmov %p2830_p3 }
  0xb2   : > { %2262 = vsyncadd (%p2833_p12), [#allocation9], 4294967152 }
  0xb3   : > { %2264 = dma.done.wait (%p2834_p0), [#allocation12], 272   ;;  %p2835_p5 = pmov %p2834_p0 }
  0xb4   : > { %p2836_p1 = pmov %p2834_p0 }
  0xb5   : > { %2266 = vsyncadd (%p2835_p5), [#allocation12], 4294967024 }
  0xb6   : > { %2268 = dma.done.wait (%p2836_p1), [#allocation15], 384   ;;  %p2837_p4 = pmov %p2834_p0 }
  0xb7   : > { %p711_p9 = scmp.lt.s32.totalorder %s2421_s1, 1  ;;  %v2302_v0 = vmov 0.0   ;;  %vm2303_vm0 = vmmov 0   ;;  %s2838_s12 = sld [smem:[#allocation25_spill]]  ;;  %vm725_vm1 = vcmask 64512   ;;  %v783_v1 = vld [vmem:[#allocation5 + $0x8] sm:$0xff] }
  0xb8   : > { %2270 = vsyncadd (%p2837_p4), [#allocation15], 4294966912  ;;  %1767 = vmatprep.subr.mxu0 %v2302_v0  ;;  %1771 = vmatprep.mubr.msk.f32.mxu0 %vm2303_vm0, %v2302_v0  ;;  %v782_v2 = vld [vmem:[#allocation5] sm:$0xff]  ;;  %v716_v3 = vld [vmem:[%s622_s9] sm:$0xff]  ;;  %vm791_vm2 = vcmask 130048   ;;  %vm882_vm3 = vcmask 1041409  }
  0xb9   : > { %1774 = vmatprep.subr.mxu1 %v2302_v0  ;;  %1776 = vmatprep.mubr.msk.f32.mxu1 %vm2303_vm0, %v2302_v0  ;;  %s712_s3 = scalar_select %p711_p9, %s2421_s1, 1  ;;  %v865_v4 = vld [vmem:[#allocation8] sm:$0xff]  ;;  %vm884_vm4 = vcmask 1042434   ;;  %vm886_vm5 = vcmask 1043459   ;;  %vm888_vm6 = vcmask 1044484   ;;  %vm890_vm7 = vcmask 1045509  }
  0xba   : > { %1768 = vmatpush3.msra.mxu0 %v783_v1  ;;  %1775 = vmatpush3.msra.mxu1 %v865_v4  ;;  %vm892_vm8 = vcmask 1046534   ;;  %vm894_vm9 = vcmask 1047559   ;;  %vm973_vm10 = vcmask 261120   ;;  %s2839_s21 = sld [smem:[#allocation34_spill]]  ;;  %vm1527_vm11 = vcmask 24576   ;;  %s1530_s18 = scalar_lea.sflag [#allocation4], %s2582_s8 }
  0xbb   : > { %s1735_s4 = sshll.u32 %s712_s3, 6  ;;  %1769 = vmatprep.subr.mxu0 %v2302_v0  ;;  %1779 = vmatprep.subr.mxu1 %v2302_v0  ;;  %s2840_s26 = sld [smem:[#allocation35_spill]] }
  0xbc   : > { %1770 = vmatpush3.msra.mxu0 %v782_v2  ;;  %s2841_s9 = sld [smem:[#allocation36_spill]]  ;;  %s1732_s3 = sshll.u32 %s2421_s1, 4 }
  0xbd   : > { %s715_s20 = scalar_lea.vmem %s2838_s12, %s1735_s4  ;;  %1772 = vmatmul.mubr.msk.f32.vlgmr.msra.gmra.mxu0 %vm791_vm2, %v716_v3  ;;  %1790 = vmatprep.subr.mxu0 %v2302_v0  ;;  %s710_s4 = scalar_lea.vmem [#allocation17], %s2582_s8 }
  0xbe   : > { %v717_v5 = vld [vmem:[%s715_s20] sm:$0xff]  ;;  %v718_v6 = vld [vmem:[%s715_s20 + $0x8] sm:$0xff]  ;;  %v719_v7 = vld [vmem:[%s715_s20 + $0x10] sm:$0xff]  ;;  %1794 = vmatprep.mubr.msk.f32.mxu0 %vm2303_vm0, %v2302_v0  ;;  %s1542_s5 = sshll.u32 %s710_s4, 4  ;;  %p2843_p7 = scmp.ne.s32.totalorder %s2824_s17, 0  ;;  %s1543_s5 = int_to_ptr.vmem [resolvable:$true] %s1542_s5 }
  0xbf   : > { %v720_v8 = vld [vmem:[%s715_s20 + $0x18] sm:$0xff]  ;;  %v721_v9 = vld [vmem:[%s715_s20 + $0x20] sm:$0xff]  ;;  %v726_v10 = vsel %vm725_vm1, %v717_v5, 0.0  ;;  %v733_v11 = vsel %vm725_vm1, %v718_v6, 0.0  ;;  %v722_v12 = vld [vmem:[%s715_s20 + $0x28] sm:$0xff]  ;;  %v740_v17 = vsel %vm725_vm1, %v719_v7, 0.0 }
  0xc0   : > { %v723_v13 = vld [vmem:[%s715_s20 + $0x30] sm:$0xff]  ;;  %v724_v14 = vld [vmem:[%s715_s20 + $0x38] sm:$0xff]  ;;  %v727_v15 = vrot.slane %v726_v10, 4  ;;  %v734_v16 = vrot.slane %v733_v11, 4  ;;  %v741_v18 = vrot.slane %v740_v17, 4  ;;  %v747_v19 = vsel %vm725_vm1, %v720_v8, 0.0 }
  0xc1   : > { %v754_v20 = vsel %vm725_vm1, %v721_v9, 0.0  ;;  %v761_v21 = vsel %vm725_vm1, %v722_v12, 0.0  ;;  %v748_v24 = vrot.slane %v747_v19, 4  ;;  %v768_v28 = vsel %vm725_vm1, %v723_v13, 0.0  ;;  %v972_v13 = vld [vmem:[%s2775_s6 + $0x18] sm:$0xff]  ;;  %s2842_s20 = sld [smem:[#allocation37_spill]] }
  0xc2   : > { %v728_v22 = vadd.f32 %v727_v15, %v726_v10  ;;  %v735_v23 = vadd.f32 %v734_v16, %v733_v11  ;;  %v755_v25 = vrot.slane %v754_v20, 4  ;;  %v742_v26 = vadd.f32 %v741_v18, %v740_v17  ;;  %v970_v15 = vld [vmem:[%s2775_s6 + $0x8] sm:$0xff]  ;;  %v969_v16 = vld [vmem:[%s2775_s6] sm:$0xff]  ;;  %s2209_s15 = scalar_lea.vmem %s1543_s5, 16  ;;  %s2304_s1 = smov [#allocation17]  }
  0xc3   : > { %v762_v27 = vrot.slane %v761_v21, 4  ;;  %v775_v29 = vsel %vm725_vm1, %v724_v14, 0.0  ;;  %v749_v32 = vadd.f32 %v748_v24, %v747_v19  ;;  %v769_v36 = vrot.slane %v768_v28, 4  ;;  %v971_v14 = vld [vmem:[%s2775_s6 + $0x10] sm:$0xff]  ;;  %v1721_v24 = vld [vmem:[#allocation7] ss:$0 sm:$0xff]  ;;  %p2210_p8 = scmp.ne.s32.totalorder %s1543_s5, %s2209_s15 }
  0xc4   : > { %v729_v30 = vrot.slane %v728_v22, 2  ;;  %v736_v31 = vrot.slane %v735_v23, 2  ;;  %v756_v33 = vadd.f32 %v755_v25, %v754_v20  ;;  %v743_v34 = vrot.slane %v742_v26, 2  ;;  %s2213_s2 = sshll.u32 %s2304_s1, 4  ;;  %s2214_s2 = int_to_ptr.vmem [resolvable:$false] %s2213_s2 }
  0xc5   : > { %v763_v35 = vadd.f32 %v762_v27, %v761_v21  ;;  %v776_v37 = vrot.slane %v775_v29, 4  ;;  %v750_v40 = vrot.slane %v749_v32, 2  ;;  %v770_v44 = vadd.f32 %v769_v36, %v768_v28  ;;  %v866_v21 = vld [vmem:[#allocation10] sm:$0x1]  ;;  %p2211_p13 = pnand %p2210_p8, %p2843_p7  ;;  %s2215_s19 = scalar_lea.vmem %s2214_s2, 32 }
  0xc6   : > { %v730_v38 = vadd.f32 %v729_v30, %v728_v22  ;;  %v737_v39 = vadd.f32 %v736_v31, %v735_v23  ;;  %v757_v41 = vrot.slane %v756_v33, 2  ;;  %v744_v42 = vadd.f32 %v743_v34, %v742_v26  ;;  %v1050_v31 = vld [vmem:[#allocation11 + $0x8] sm:$0xff]  ;;  %p2216_p11 = scmp.lt.s32.totalorder %s1543_s5, %s2214_s2  ;;  %p2217_p3 = scmp.lt.s32.totalorder %s2215_s19, %s2209_s15 }
  0xc7   : > { %v764_v43 = vrot.slane %v763_v35, 2  ;;  %v777_v45 = vadd.f32 %v776_v37, %v775_v29  ;;  %v751_v48 = vadd.f32 %v750_v40, %v749_v32  ;;  %v771_v52 = vrot.slane %v770_v44, 2  ;;  %1791 = vmatpush3.msra.mxu0 %v1050_v31  ;;  %v1049_v32 = vld [vmem:[#allocation11] sm:$0xff]  ;;  %v1131_v37 = vld [vmem:[#allocation14] sm:$0xff]  ;;  %p2212_p2 = pneg %p2211_p13 }
  0xc8   : > { %v731_v46 = vrot.slane %v730_v38, 1  ;;  %v738_v47 = vrot.slane %v737_v39, 1  ;;  %v758_v49 = vadd.f32 %v757_v41, %v756_v33  ;;  %v745_v50 = vrot.slane %v744_v42, 1  ;;  %1792 = vmatprep.subr.mxu0 %v2302_v0  ;;  %v1212_v40 = vld [vmem:[%s2780_s11 + $0x8] sm:$0xff]  ;;  %v1211_v41 = vld [vmem:[%s2780_s11] sm:$0xff]  ;;  %p2218_p6 = por %p2217_p3, %p2216_p11 }
  0xc9   : > { %v765_v51 = vadd.f32 %v764_v43, %v763_v35  ;;  %v778_v53 = vrot.slane %v777_v45, 2  ;;  %v752_v56 = vrot.slane %v751_v48, 1  ;;  %v772_v60 = vadd.f32 %v771_v52, %v770_v44  ;;  %1793 = vmatpush3.msra.mxu0 %v1049_v32 }
  0xca   : > { %v732_v54 = vadd.f32 %v731_v46, %v730_v38  ;;  %v739_v55 = vadd.f32 %v738_v47, %v737_v39  ;;  %v759_v57 = vrot.slane %v758_v49, 1  ;;  %v746_v58 = vadd.f32 %v745_v50, %v744_v42  ;;  %1797 = vmatprep.subr.mxu0 %v2302_v0  ;;  %v1214_v38 = vld [vmem:[%s2780_s11 + $0x18] sm:$0xff]  ;;  %v1213_v39 = vld [vmem:[%s2780_s11 + $0x10] sm:$0xff]  ;;  %v1132_v42 = vld [vmem:[%s2779_s10] sm:$0x1]  ;;  %p2219_p10 = pnand %p2218_p6, %p2212_p2 }
  0xcb   : > { %v766_v59 = vrot.slane %v765_v51, 1  ;;  %v779_v61 = vadd.f32 %v778_v53, %v777_v45  ;;  %v753_v62 = vadd.f32 %v752_v56, %v751_v48  ;;  %v773_v3 = vrot.slane %v772_v60, 1  ;;  %v1725_v46 = vld [vmem:[#allocation13] ss:$0 sm:$0xff]  ;;  %v1298_v53 = vld [vmem:[#allocation16 + $0x8] sm:$0xff] }
  0xcc   : > { %v760_v63 = vadd.f32 %v759_v57, %v758_v49  ;;  %v883_v1 = vsel %vm882_vm3, %v739_v55, %v732_v54  ;;  %v869_v19 = vlaneseq  ;;  %v867_v22 = vmul.f32 8.0, %v866_v21  ;;  %v1297_v54 = vld [vmem:[#allocation16] sm:$0xff] }
  0xcd   : > { %v767_v2 = vadd.f32 %v766_v59, %v765_v51  ;;  %v780_v4 = vrot.slane %v779_v61, 1  ;;  %v885_v5 = vsel %vm884_vm4, %v746_v58, %v883_v1  ;;  %v774_v7 = vadd.f32 %v773_v3, %v772_v60  ;;  %v1376_v3 = vld [vmem:[%s2783_s14 + $0x18] sm:$0xff] }
  0xce   : > { %v887_v6 = vsel %vm886_vm5, %v753_v62, %v885_v5  ;;  %v870_v20 = vshrl.u32 %v869_v19, 7  ;;  %v1133_v43 = vmul.f32 8.0, %v1132_v42  ;;  %v1374_v5 = vld [vmem:[%s2783_s14 + $0x8] sm:$0xff] }
  0xcf   : > { %v781_v8 = vadd.f32 %v780_v4, %v779_v61  ;;  %v889_v9 = vsel %vm888_vm6, %v760_v63, %v887_v6  ;;  %v1375_v4 = vld [vmem:[%s2783_s14 + $0x10] sm:$0xff]  ;;  %v1373_v6 = vld [vmem:[%s2783_s14] sm:$0xff] }
  0xd0   : > { %v891_v10 = vsel %vm890_vm7, %v767_v2, %v889_v9  ;;  %v871_v23 = vsub.s32 0, %v870_v20 }
  0xd1   : > { %v893_v11 = vsel %vm892_vm8, %v774_v7, %v891_v10  ;;  %v1452_v7 = vld [vmem:[%s2785_s16 + $0x8] sm:$0xff] }
  0xd2   : > { %v895_v12 = vsel %vm894_vm9, %v781_v8, %v893_v11  ;;  %v872_v25 = vrot.slane %v867_v22, %v871_v23  ;;  %v1138_v45 = vrot.slane %v1133_v43, %v871_v23  ;;  %v1299_v8 = vld [vmem:[%s2839_s21] sm:$0x1]  ;;  %s2732_s21 = scalar_lea.hbm %s2842_s20, %s1732_s3 }
  0xd3   : > { %1777 = vmatmul.mubr.msk.f32.vlgmr.msra.gmra.mxu1 %vm725_vm1, %v895_v12 }
  0xd4   : > { %1787 = vmatprep.mubr.msk.f32.mxu1 %vm2303_vm0, %v2302_v0  ;;  %1780 = vmatpush3.msra.mxu1 %v972_v13  ;;  %v1377_v13 = vld [vmem:[%s2840_s26] sm:$0x1] }
  0xd5   : > { %1781 = vmatprep.subr.mxu1 %v2302_v0 }
  0xd6   : > { %1782 = vmatpush3.msra.mxu1 %v971_v14 }
  0xd7   : > { %1783 = vmatprep.subr.mxu1 %v2302_v0 }
  0xd8   : > { %1784 = vmatpush3.msra.mxu1 %v970_v15 }
  0xd9   : > { %1785 = vmatprep.subr.mxu1 %v2302_v0 }
  0xda   : > { %1786 = vmatpush3.msra.mxu1 %v969_v16  ;;  %v1453_v16 = vld [vmem:[%s2841_s9] sm:$0x1] }
  0xdb   : > { %1802 = vmatprep.subr.mxu1 %v2302_v0 }
 0x17d   : > { %v861_v17 = vpop.f32.mrf.mxu0 }
 0x17e   : > { %v862_v26 = vadd.f32 %v1721_v24, %v861_v17 }
 0x17f   : > { %v1773_v18 = vpop.f32.mrf.mxu0 }
 0x193   : > { %v964_v27 = vpop.f32.mrf.mxu1 }
 0x194   : > { %v965_v28 = vadd.f32 %v964_v27, %v872_v25 }
 0x195   : > { %v1778_v29 = vpop.f32.mrf.mxu1 }
 0x196   : > { %v968_v30 = vmul.f32 %v965_v28, %v862_v26 }
 0x198   : > { %1788 = vmatmul.mubr.msk.f32.vlgmr.msra.gmra.mxu1 %vm973_vm10, %v968_v30 }
 0x199   : > { %1810 = vmatprep.mubr.msk.f32.mxu1 %vm2303_vm0, %v2302_v0  ;;  %1803 = vmatpush3.msra.mxu1 %v1214_v38 }
 0x19a   : > { %1804 = vmatprep.subr.mxu1 %v2302_v0 }
 0x19b   : > { %1805 = vmatpush3.msra.mxu1 %v1213_v39 }
 0x19c   : > { %1806 = vmatprep.subr.mxu1 %v2302_v0 }
 0x19d   : > { %1807 = vmatpush3.msra.mxu1 %v1212_v40 }
 0x19e   : > { %1808 = vmatprep.subr.mxu1 %v2302_v0 }
 0x19f   : > { %1809 = vmatpush3.msra.mxu1 %v1211_v41 }
 0x1a0   : > { %1831 = vmatprep.subr.mxu1 %v2302_v0 }
 0x258   : > { %v1043_v33 = vpop.f32.mrf.mxu1 }
 0x259   : > { %1969 = vtanh.f32 %v1043_v33 }
 0x25a   : > { %v1789_v34 = vpop.f32.mrf.mxu1 }
 0x266   : > { %v1970_v35 = vpop.eup %1969 }
 0x267   : > { %v1048_v36 = vadd.f32 %v1970_v35, %v1043_v33 }
 0x269   : > { %1795 = vmatmul.mubr.msk.f32.vlgmr.msra.gmra.mxu0 %vm791_vm2, %v1048_v36 }
 0x26a   : > { %1798 = vmatpush3.msra.mxu0 %v1131_v37  ;;  %1799 = vmatprep.mubr.msk.f32.mxu0 %vm2303_vm0, %v2302_v0 }
 0x26b   : > { %1813 = vmatprep.subr.mxu0 %v2302_v0 }
 0x26d   : > { %1800 = vmatmul.mubr.msk.f32.vlgmr.msra.gmra.mxu0 %vm725_vm1, %v895_v12  ;;  %v1451_v12 = vld [vmem:[%s2785_s16] sm:$0xff] }
 0x26e   : > { %1817 = vmatprep.mubr.msk.f32.mxu0 %vm2303_vm0, %v2302_v0  ;;  %1814 = vmatpush3.msra.mxu0 %v1298_v53 }
 0x26f   : > { %1815 = vmatprep.subr.mxu0 %v2302_v0 }
 0x270   : > { %1816 = vmatpush3.msra.mxu0 %v1297_v54 }
 0x271   : > { %1820 = vmatprep.subr.mxu0 %v2302_v0 }
 0x329   : > { %v1127_v44 = vpop.f32.mrf.mxu0 }
 0x32a   : > { %v1128_v49 = vadd.f32 %v1725_v46, %v1127_v44 }
 0x32b   : > { %v1796_v47 = vpop.f32.mrf.mxu0 }
 0x32d   : > { %v1206_v48 = vpop.f32.mrf.mxu0 }
 0x32e   : > { %v1207_v50 = vadd.f32 %v1206_v48, %v1138_v45 }
 0x32f   : > { %v1801_v51 = vpop.f32.mrf.mxu0 }
 0x330   : > { %v1210_v52 = vmul.f32 %v1207_v50, %v1128_v49 }
 0x332   : > { %1811 = vmatmul.mubr.msk.f32.vlgmr.msra.gmra.mxu1 %vm973_vm10, %v1210_v52 }
 0x333   : > { %1835 = vmatprep.mubr.msk.f32.mxu1 %vm2303_vm0, %v2302_v0  ;;  %1832 = vmatpush3.msra.mxu1 %v1452_v7 }
 0x334   : > { %1833 = vmatprep.subr.mxu1 %v2302_v0 }
 0x335   : > { %1834 = vmatpush3.msra.mxu1 %v1451_v12 }
 0x3f2   : > { %v1284_v55 = vpop.f32.mrf.mxu1 }
 0x3f3   : > { %1971 = vtanh.f32 %v1284_v55 }
 0x3f4   : > { %v1812_v56 = vpop.f32.mrf.mxu1 }
 0x400   : > { %v1972_v57 = vpop.eup %1971 }
 0x401   : > { %v1289_v58 = vadd.f32 %v1972_v57, %v1284_v55 }
 0x403   : > { %v1290_v59 = vsel %vm791_vm2, %v1289_v58, 0.0 }
 0x404   : > { %v1291_v60 = vrot.slane %v1290_v59, 4 }
 0x406   : > { %v1292_v61 = vadd.f32 %v1291_v60, %v1290_v59 }
 0x408   : > { %v1293_v62 = vrot.slane %v1292_v61, 2 }
 0x40a   : > { %v1294_v63 = vadd.f32 %v1293_v62, %v1292_v61 }
 0x40c   : > { %v1295_v1 = vrot.slane %v1294_v63, 1 }
 0x40e   : > { %v1296_v2 = vadd.f32 %v1295_v1, %v1294_v63 }
 0x410   : > { %1818 = vmatmul.mubr.msk.f32.vlgmr.msra.gmra.mxu0 %vm791_vm2, %v1296_v2 }
 0x411   : > { %1821 = vmatpush3.msra.mxu0 %v1376_v3  ;;  %1828 = vmatprep.mubr.msk.f32.mxu0 %vm2303_vm0, %v2302_v0 }
 0x412   : > { %1822 = vmatprep.subr.mxu0 %v2302_v0 }
 0x413   : > { %1823 = vmatpush3.msra.mxu0 %v1375_v4 }
 0x414   : > { %1824 = vmatprep.subr.mxu0 %v2302_v0 }
 0x415   : > { %1825 = vmatpush3.msra.mxu0 %v1374_v5 }
 0x416   : > { %1826 = vmatprep.subr.mxu0 %v2302_v0 }
 0x417   : > { %1827 = vmatpush3.msra.mxu0 %v1373_v6 }
 0x4d0   : > { %v1369_v9 = vpop.f32.mrf.mxu0 }
 0x4d1   : > { %v1370_v10 = vadd.f32 %v1369_v9, %v1299_v8 }
 0x4d2   : > { %v1819_v11 = vpop.f32.mrf.mxu0 }
 0x4d3   : > { %1829 = vmatmul.mubr.msk.f32.vlgmr.msra.gmra.mxu0 %vm973_vm10, %v1370_v10 }
 0x593   : > { %v1447_v0 = vpop.f32.mrf.mxu0 }
 0x594   : > { %v1448_v14 = vadd.f32 %v1447_v0, %v1377_v13 }
 0x595   : > { %v1830_v15 = vpop.f32.mrf.mxu0 }
 0x596   : > { %1836 = vmatmul.mubr.msk.f32.vlgmr.msra.gmra.mxu1 %vm791_vm2, %v1448_v14 }
 0x656   : > { %v1523_v17 = vpop.f32.mrf.mxu1 }
 0x657   : > { %v1524_v18 = vadd.f32 %v1523_v17, %v1453_v16 }
 0x658   : > { %v1837_v19 = vpop.f32.mrf.mxu1 }
 0x659   : > { %1528 = vst.msk [vmem:[%s710_s4] sm:$0x1] %vm1527_vm11, %v1524_v18 }
 0x65a   : > { %2222 = shalt.err (!%p2219_p10)
}
 0x65b   : > { %s2223_s26 = scalar_lea.hbm %s2732_s21, 16  ;;  %s2227_s13 = scalar_lea.hbm %s2842_s20, 32 }
 0x65c   : > { %p2224_p12 = scmp.ne.s32.totalorder %s2732_s21, %s2223_s26  ;;  %p2228_p1 = scmp.lt.s32.totalorder %s2732_s21, %s2842_s20 }
 0x65d   : > { %p2229_p4 = scmp.lt.s32.totalorder %s2227_s13, %s2223_s26 }
 0x65e   : > { %p2225_p0 = pnand %p2224_p12, %p2843_p7 }
 0x65f   : > { %p2230_p9 = por %p2229_p4, %p2228_p1 }
 0x660   : > { %p2226_p5 = pneg %p2225_p0 }
 0x662   : > { %p2231_p8 = pnand %p2230_p9, %p2226_p5 }
 0x664   : > { %2234 = shalt.err (!%p2231_p8)
}
 0x665   : > { %1872 = dma.vmem_to_hbm [thread:$0]  (%p2843_p7), %s1543_s5, 16, %s2732_s21, %s1530_s18  }
 0x666 PF: > { %s1554_s4 = sand.u32 1, %s2277_s27   ;;  %p2844_p13 = scmp.ne.s32.totalorder %s2825_s24, 0 }
 0x667   : > { %p2845_p2 = scmp.ge.s32.totalorder %s2289_s30, 2  ;;  %s1555_s7 = scalar_lea.sflag [#allocation4], %s1554_s4 }
 0x669   : > { %p1904_p11 = pnand %p2845_p2, %p2844_p13 }
 0x66b   : > { %p1905_p3 = pneg %p1904_p11 }
 0x66d   : > { %2272 = dma.done.wait (%p1905_p3), %s1555_s7, 16  }
 0x66e   : > { %2274 = vsyncadd (%p1905_p3), %s1555_s7, 4294967280  ;;  %p35_p6 = scmp.ge.s32.totalorder %s2519_s25, 4   ;;  %s2846_s27 = smov %s2281_s28 }
 0x66f   : > { %s2847_s28 = smov %s2285_s29  ;;  %s2848_s29 = smov %s2530_s0 }
 0x670   : > { %s2849_s30 = smov %s2519_s25  ;;  %37 = sbr.rel (!%p35_p6) target bundleno = 24 (0x18), region = 172 }
 0x675   :  { %1559 = vsyncpa [#allocation3], 1 }
 0x676   :  { %1561 = vsyncpa [#allocation3 + $0x1], 1 }
 0x677   :  { %1562 = vsyncpa [#allocation6], 1 }
 0x678   :  { %1563 = vsyncpa [#allocation9], 1 }
 0x679   :  { %1564 = vsyncpa [#allocation12], 1 }
 0x67a   :  { %1565 = vsyncpa [#allocation15], 1 }
 0x67b   :  { %1566 = vsyncpa [#allocation4], 1 }
 0x67c   :  { %1568 = vsyncpa [#allocation4 + $0x1], 1 }

</bundles_post_ra>
